<compile_context>
chip_gen: v7x
topology: tpu7x:2x2x1
jax: 0.10.0
libtpu: 0.0.40
codegen_flags: <defaults>
</compile_context>

<pallas_src>
import functools
import math

import jax
import jax.numpy as jnp
from jax.experimental import pallas as pl
from jax.experimental.pallas import tpu as pltpu


# ----------------------------- kernel ---------------------------------------
def transformer_block_kernel(x_ref, w_kvq_ref, wu_ref, bu_ref,
                             g1_ref, beta1_ref, w1_ref, b1_ref,
                             w2_ref, b2_ref, g2_ref, beta2_ref,
                             o_ref, *scratch,
                             heads, q_tile, multi_tile, approx_recip):
    cdt = w_kvq_ref.dtype                      # MXU compute dtype (bf16 or f32)
    t = x_ref.shape[1]                         # full sequence length
    e = x_ref.shape[2]
    s = e // heads
    scale = 1.0 / math.sqrt(e)                 # == (e**-0.25) applied to q and k each

    j = pl.program_id(1)
    row0 = pl.multiple_of(j * q_tile, q_tile)

    if multi_tile:
        kv_scr, ctx_scr = scratch
        # ---- K/V for the whole sequence: computed once per batch row, cached ----
        @pl.when(j == 0)
        def _():
            x_full = x_ref[0]                                        # (t, e)
            kv = jnp.dot(x_full.astype(cdt), w_kvq_ref[:, :2 * e],
                         preferred_element_type=jnp.float32)         # (t, 2e) f32
            kv_scr[...] = kv.astype(cdt)
        kv = kv_scr[...]                                             # (t, 2e) cdt
        k = kv[:, :e]
        v = kv[:, e:]
        # ---- Q only for this tile's rows (scale folded in once) ----
        x_q = x_ref[0, pl.ds(row0, q_tile), :]                       # (TQ, e)
        q = (jnp.dot(x_q.astype(cdt), w_kvq_ref[:, 2 * e:],
                     preferred_element_type=jnp.float32) * scale).astype(cdt)
    else:
        (ctx_scr,) = scratch
        # single Q tile: one fully-fused matmul produces K, V and Q
        x_q = x_ref[0]                                               # (t, e)
        kvq = jnp.dot(x_q.astype(cdt), w_kvq_ref[...],
                      preferred_element_type=jnp.float32)            # (t, 3e) f32
        k = kvq[:, 0 * e:1 * e].astype(cdt)
        v = kvq[:, 1 * e:2 * e].astype(cdt)
        q = (kvq[:, 2 * e:3 * e] * scale).astype(cdt)

    x_q_f32 = x_q.astype(jnp.float32)

    # ---- multi-head attention; per-head contexts assembled into ctx scratch ----
    for hh in range(heads):                    # static / unrolled (small head counts)
        lo = hh * s
        qh = q[:, lo:lo + s]                   # (TQ, s) cdt, pre-scaled
        kh = k[:, lo:lo + s]                   # (t,  s) cdt
        vh = v[:, lo:lo + s]                   # (t,  s) cdt
        # scores = qh @ kh^T without materializing a transpose (contract last dims)
        sc = jax.lax.dot_general(qh, kh, (((1,), (1,)), ((), ())),
                                 preferred_element_type=jnp.float32)  # (TQ, t) f32
        sc = sc - jnp.max(sc, axis=-1, keepdims=True)                 # stable softmax
        p = jnp.exp(sc)
        p = p * pl.reciprocal(jnp.sum(p, axis=-1, keepdims=True), approx=approx_recip)
        ctx = jnp.dot(p.astype(cdt), vh, preferred_element_type=jnp.float32)  # (TQ, s)
        ctx_scr[:, lo:lo + s] = ctx.astype(cdt)

    # ---- single full-rate unify-heads matmul (contraction K = e) ----
    att = jnp.dot(ctx_scr[...], wu_ref[...],
                  preferred_element_type=jnp.float32) + bu_ref[...]   # (TQ, e) f32

    # ---- residual + LayerNorm1 (f32, eps=1e-5, biased variance like torch) ----
    y = att + x_q_f32
    mu = jnp.mean(y, axis=-1, keepdims=True)
    var = jnp.mean((y - mu) ** 2, axis=-1, keepdims=True)
    y = (y - mu) * jax.lax.rsqrt(var + 1e-5) * g1_ref[...] + beta1_ref[...]

    # ---- feed-forward (only TQ rows): Linear -> ReLU -> Linear ----
    h1 = jnp.dot(y.astype(cdt), w1_ref[...], preferred_element_type=jnp.float32) + b1_ref[...]
    h1 = jnp.maximum(h1, 0.0)
    ff = jnp.dot(h1.astype(cdt), w2_ref[...], preferred_element_type=jnp.float32) + b2_ref[...]

    # ---- residual + LayerNorm2 ----
    z = ff + y
    mu2 = jnp.mean(z, axis=-1, keepdims=True)
    var2 = jnp.mean((z - mu2) ** 2, axis=-1, keepdims=True)
    z = (z - mu2) * jax.lax.rsqrt(var2 + 1e-5) * g2_ref[...] + beta2_ref[...]

    # dropout(p=0.0) is the identity -- omitted.
    o_ref[0] = z.astype(o_ref.dtype)


# ----------------------------- wrappers --------------------------------------
@functools.lru_cache(maxsize=1)
def _vmem_capacity_bytes() -> int:
    try:
        return int(pltpu.get_tpu_info().vmem_capacity_bytes)
    except Exception:
        return 128 * 1024 * 1024               # v5e/v6e default


def _pick_q_tile(t: int, vmem_bytes: int) -> int:
    # cap tiles lower on 64 MiB-VMEM parts (v7x); bigger tiles on 128 MiB parts
    # (v5e/v6e) amortize the ~0.35 us/step pipeline overhead.
    cap = 256 if vmem_bytes <= 64 * 1024 * 1024 else 512
    if t <= cap:
        return t
    for cand in (512, 256, 128, 64, 32, 16, 8):
        if cand <= cap and t % cand == 0:
            return cand
    return t


def _const_spec(a):
    # Resident parameter: same block index every grid step, so Pallas only DMAs
    # it once per pallas_call.
    # TODO(synk): pipeline_mode=pl.Buffered(1) on v7x to halve resident-weight VMEM.
    zero_idx = (0,) * a.ndim
    return pl.BlockSpec(a.shape, lambda i, j, _z=zero_idx: _z)


def prepare_block_params(params, *, compute_dtype=jnp.bfloat16):
    """One-time weight preprocessing (fused KVQ concat + dtype casts).

    Hoisted out of the forward pass so it is not re-executed per layer / step.
    Column order of the fused projection weight is [K | V | Q].
    """
    cdt = jnp.dtype(compute_dtype)
    f32 = lambda a: jnp.asarray(a, jnp.float32)
    w_kvq = jnp.concatenate(
        [f32(params["wk"]), f32(params["wv"]), f32(params["wq"])], axis=1).astype(cdt)
    return (
        w_kvq,
        jnp.asarray(params["wu"]).astype(cdt), f32(params["bu"]),
        f32(params["g1"]), f32(params["beta1"]),
        jnp.asarray(params["w1"]).astype(cdt), f32(params["b1"]),
        jnp.asarray(params["w2"]).astype(cdt), f32(params["b2"]),
        f32(params["g2"]), f32(params["beta2"]),
    )


def prepare_transformer_params(block_params, *, compute_dtype=jnp.bfloat16):
    return [prepare_block_params(p, compute_dtype=compute_dtype) for p in block_params]


def transformer_block(x, prepared, heads, *, q_tile=None, out_dtype=None):
    b, t, e = x.shape
    cdt = prepared[0].dtype                    # compute dtype (MXU operand dtype)
    out_dtype = jnp.dtype(out_dtype) if out_dtype is not None else jnp.dtype(jnp.float32)

    vmem_bytes = _vmem_capacity_bytes()
    if q_tile is None:
        q_tile = _pick_q_tile(t, vmem_bytes)
    assert t % q_tile == 0
    n_tiles = t // q_tile
    multi_tile = n_tiles > 1

    kernel = functools.partial(
        transformer_block_kernel, heads=heads, q_tile=q_tile,
        multi_tile=multi_tile,
        approx_recip=(cdt != jnp.dtype(jnp.float32)))

    if multi_tile:
        scratch_shapes = [pltpu.VMEM((t, 2 * e), cdt),     # cached K|V per batch row
                          pltpu.VMEM((q_tile, e), cdt)]    # per-head context assembly
    else:
        scratch_shapes = [pltpu.VMEM((q_tile, e), cdt)]

    return pl.pallas_call(
        kernel,
        out_shape=jax.ShapeDtypeStruct((b, t, e), out_dtype),
        grid_spec=pltpu.PrefetchScalarGridSpec(
            num_scalar_prefetch=0,
            grid=(b, n_tiles),
            in_specs=[pl.BlockSpec((1, t, e), lambda i, j: (i, 0, 0))]
                     + [_const_spec(p) for p in prepared],
            out_specs=pl.BlockSpec((1, q_tile, e), lambda i, j: (i, j, 0)),
            scratch_shapes=scratch_shapes,
        ),
        compiler_params=pltpu.CompilerParams(
            # batch axis parallel (megacore); seq-tile axis must stay sequential
            # when K/V are cached in scratch across Q tiles.
            dimension_semantics=("parallel", "arbitrary" if multi_tile else "parallel"),
            vmem_limit_bytes=min(int(vmem_bytes * 3 // 4), 96 * 1024 * 1024),
        ),
    )(x, *prepared)


def transformer_forward(x, prepared_blocks, heads, *, final_dtype=jnp.float32, q_tile=None):
    """Full Transformer: input dropout(p=0)=identity, then `depth` blocks.

    Intermediate-layer activations stay in the compute dtype (halved HBM
    writeback, no wrapper-side convert); the final layer emits `final_dtype`.
    """
    n = len(prepared_blocks)
    for li, prepared in enumerate(prepared_blocks):
        cdt = prepared[0].dtype
        out_dtype = final_dtype if li == n - 1 else cdt
        x = transformer_block(x, prepared, heads, q_tile=q_tile, out_dtype=out_dtype)
    return x


# ---------------- pure-JAX reference (for correctness check) ----------------
def _layernorm(y, g, beta):
    mu = jnp.mean(y, axis=-1, keepdims=True)
    var = jnp.mean((y - mu) ** 2, axis=-1, keepdims=True)
    return (y - mu) * jax.lax.rsqrt(var + 1e-5) * g + beta


def transformer_block_ref(x, p, heads):
    b, t, e = x.shape
    s = e // heads
    scale = e ** 0.25
    k = (x @ p["wk"]) / scale
    q = (x @ p["wq"]) / scale
    v = x @ p["wv"]
    k = k.reshape(b, t, heads, s).transpose(0, 2, 1, 3)
    q = q.reshape(b, t, heads, s).transpose(0, 2, 1, 3)
    v = v.reshape(b, t, heads, s).transpose(0, 2, 1, 3)
    dot = jnp.einsum("bhts,bhks->bhtk", q, k)
    dot = jax.nn.softmax(dot, axis=-1)
    out = jnp.einsum("bhtk,bhks->bhts", dot, v)
    out = out.transpose(0, 2, 1, 3).reshape(b, t, e)
    att = out @ p["wu"] + p["bu"]
    y = _layernorm(att + x, p["g1"], p["beta1"])
    ff = jax.nn.relu(y @ p["w1"] + p["b1"]) @ p["w2"] + p["b2"]
    return _layernorm(ff + y, p["g2"], p["beta2"])


def transformer_ref(x, block_params, heads):
    for p in block_params:
        x = transformer_block_ref(x, p, heads)
    return x


# ----------------------------- demo / check ----------------------------------
def _make_block_params(key, emb, hid):
    ks = jax.random.split(key, 12)
    w = lambda k, shape, s=0.1: (s * jax.random.normal(k, shape)).astype(jnp.float32)
    return {
        "wk": w(ks[0], (emb, emb)),
        "wq": w(ks[1], (emb, emb)),
        "wv": w(ks[2], (emb, emb)),
        "wu": w(ks[3], (emb, emb)),
        "bu": w(ks[4], (1, emb), 0.05),
        "g1": 1.0 + w(ks[5], (1, emb), 0.1),
        "beta1": w(ks[6], (1, emb), 0.05),
        "w1": w(ks[7], (emb, hid)),
        "b1": w(ks[8], (1, hid), 0.05),
        "w2": w(ks[9], (hid, emb)),
        "b2": w(ks[10], (1, emb), 0.05),
        "g2": 1.0 + w(ks[11], (1, emb), 0.1),
        "beta2": jnp.zeros((1, emb), jnp.float32),
    }


if __name__ == "__main__":
    B, T, EMB, HEADS, DEPTH, FF_MULT = 2, 8, 32, 2, 2, 4   # Transformer default ff_hidden_mult=4
    HID = FF_MULT * EMB

    key = jax.random.PRNGKey(0)
    kx, kx2, kb2, *bkeys = jax.random.split(key, DEPTH + 3)
    blocks = [_make_block_params(k, EMB, HID) for k in bkeys]
    x = jax.random.normal(kx, (B, T, EMB), dtype=jnp.float32)

    ref = transformer_ref(x, blocks, HEADS)

    # --- exact-precision path (f32 MXU operands, f32 activations) ------------
    prep_f32 = prepare_transformer_params(blocks, compute_dtype=jnp.float32)
    out_f32 = jax.block_until_ready(transformer_forward(x, prep_f32, HEADS))
    assert out_f32.shape == (B, T, EMB)
    assert jnp.allclose(out_f32, ref, atol=1e-4, rtol=1e-4), "f32 kernel mismatch vs reference"

    # --- recommended perf path (bf16 MXU operands, bf16 inter-layer acts) ----
    prep_bf16 = prepare_transformer_params(blocks, compute_dtype=jnp.bfloat16)
    out_bf16 = jax.block_until_ready(transformer_forward(x, prep_bf16, HEADS))
    assert out_bf16.shape == (B, T, EMB)
    assert jnp.allclose(out_bf16, ref, atol=6e-2, rtol=6e-2), "bf16 kernel mismatch vs reference"

    # --- multi-Q-tile path (exercises the cached-K/V scratch branch) ---------
    T2 = 16
    x2 = jax.random.normal(kx2, (B, T2, EMB), dtype=jnp.float32)
    blocks2 = [_make_block_params(kb2, EMB, HID)]
    ref2 = transformer_ref(x2, blocks2, HEADS)

    prep2_f32 = prepare_transformer_params(blocks2, compute_dtype=jnp.float32)
    out2_f32 = jax.block_until_ready(transformer_forward(x2, prep2_f32, HEADS, q_tile=8))
    assert jnp.allclose(out2_f32, ref2, atol=1e-4, rtol=1e-4), "multi-tile f32 mismatch"

    prep2_bf16 = prepare_transformer_params(blocks2, compute_dtype=jnp.bfloat16)
    out2_bf16 = jax.block_until_ready(transformer_forward(x2, prep2_bf16, HEADS, q_tile=8))
    assert jnp.allclose(out2_bf16, ref2, atol=6e-2, rtol=6e-2), "multi-tile bf16 mismatch"

    print("KERNEL_OK")
</pallas_src>

<mosaic_0001>
module attributes {stable_mosaic.version = 11 : i64} {
  func.func @transformer_block_kernel(%arg0: i32, %arg1: i32, %arg2: memref<1x8x32xf32, #tpu.memory_space<vmem>>, %arg3: memref<32x96xf32, #tpu.memory_space<vmem>>, %arg4: memref<32x32xf32, #tpu.memory_space<vmem>>, %arg5: memref<1x32xf32, #tpu.memory_space<vmem>>, %arg6: memref<1x32xf32, #tpu.memory_space<vmem>>, %arg7: memref<1x32xf32, #tpu.memory_space<vmem>>, %arg8: memref<32x128xf32, #tpu.memory_space<vmem>>, %arg9: memref<1x128xf32, #tpu.memory_space<vmem>>, %arg10: memref<128x32xf32, #tpu.memory_space<vmem>>, %arg11: memref<1x32xf32, #tpu.memory_space<vmem>>, %arg12: memref<1x32xf32, #tpu.memory_space<vmem>>, %arg13: memref<1x32xf32, #tpu.memory_space<vmem>>, %arg14: memref<1x8x32xf32, #tpu.memory_space<vmem>>, %arg15: memref<8x32xf32, #tpu.memory_space<vmem>>) attributes {dimension_semantics = [#tpu.dimension_semantics<parallel>, #tpu.dimension_semantics<parallel>], iteration_bounds = array<i64: 2, 1>, scalar_prefetch = 0 : i64, scratch_operands = 1 : i64, tpu.core_type = #tpu.core_type<tc>, window_params = [{transform_indices = @transform_0, window_bounds = array<i64: 1, 8, 32>}, {pipeline_mode = #tpu.pipeline_mode<synchronous>, transform_indices = @transform_1, window_bounds = array<i64: 32, 96>}, {pipeline_mode = #tpu.pipeline_mode<synchronous>, transform_indices = @transform_2, window_bounds = array<i64: 32, 32>}, {pipeline_mode = #tpu.pipeline_mode<synchronous>, transform_indices = @transform_3, window_bounds = array<i64: 1, 32>}, {pipeline_mode = #tpu.pipeline_mode<synchronous>, transform_indices = @transform_4, window_bounds = array<i64: 1, 32>}, {pipeline_mode = #tpu.pipeline_mode<synchronous>, transform_indices = @transform_5, window_bounds = array<i64: 1, 32>}, {pipeline_mode = #tpu.pipeline_mode<synchronous>, transform_indices = @transform_6, window_bounds = array<i64: 32, 128>}, {pipeline_mode = #tpu.pipeline_mode<synchronous>, transform_indices = @transform_7, window_bounds = array<i64: 1, 128>}, {pipeline_mode = #tpu.pipeline_mode<synchronous>, transform_indices = @transform_8, window_bounds = array<i64: 128, 32>}, {pipeline_mode = #tpu.pipeline_mode<synchronous>, transform_indices = @transform_9, window_bounds = array<i64: 1, 32>}, {pipeline_mode = #tpu.pipeline_mode<synchronous>, transform_indices = @transform_10, window_bounds = array<i64: 1, 32>}, {pipeline_mode = #tpu.pipeline_mode<synchronous>, transform_indices = @transform_11, window_bounds = array<i64: 1, 32>}, {transform_indices = @transform_12, window_bounds = array<i64: 1, 8, 32>}]} {
    %c0 = arith.constant 0 : index
    %c0_0 = arith.constant 0 : index
    %c0_1 = arith.constant 0 : index
    %0 = vector.load %arg2[%c0, %c0_0, %c0_1] : memref<1x8x32xf32, #tpu.memory_space<vmem>>, vector<1x8x32xf32>
    %1 = vector.shape_cast %0 : vector<1x8x32xf32> to vector<8x32xf32>
    %c0_2 = arith.constant 0 : index
    %c0_3 = arith.constant 0 : index
    %2 = vector.load %arg3[%c0_2, %c0_3] : memref<32x96xf32, #tpu.memory_space<vmem>>, vector<32x96xf32>
    %cst = arith.constant dense<0.000000e+00> : vector<8x96xf32>
    %3 = tpu.matmul %1, %2, %cst {dimension_numbers = #tpu.dot_dimension_numbers<[1], [0], [0], [1], [0, 0, 1, 1], [], []>} : vector<8x32xf32>, vector<32x96xf32>, vector<8x96xf32> -> vector<8x96xf32>
    %4 = vector.extract_strided_slice %3 {offsets = [0, 0], sizes = [8, 32], strides = [1, 1]} : vector<8x96xf32> to vector<8x32xf32>
    %5 = vector.extract_strided_slice %3 {offsets = [0, 32], sizes = [8, 32], strides = [1, 1]} : vector<8x96xf32> to vector<8x32xf32>
    %6 = vector.extract_strided_slice %3 {offsets = [0, 64], sizes = [8, 32], strides = [1, 1]} : vector<8x96xf32> to vector<8x32xf32>
    %cst_4 = arith.constant 0.176776692 : f32
    %7 = vector.broadcast %cst_4 : f32 to vector<8x32xf32>
    %8 = arith.mulf %6, %7 : vector<8x32xf32>
    %9 = vector.extract_strided_slice %8 {offsets = [0, 0], sizes = [8, 16], strides = [1, 1]} : vector<8x32xf32> to vector<8x16xf32>
    %10 = vector.extract_strided_slice %4 {offsets = [0, 0], sizes = [8, 16], strides = [1, 1]} : vector<8x32xf32> to vector<8x16xf32>
    %11 = vector.extract_strided_slice %5 {offsets = [0, 0], sizes = [8, 16], strides = [1, 1]} : vector<8x32xf32> to vector<8x16xf32>
    %cst_5 = arith.constant dense<0.000000e+00> : vector<8x8xf32>
    %12 = tpu.matmul %9, %10, %cst_5 {dimension_numbers = #tpu.dot_dimension_numbers<[1], [1], [0], [0], [0, 0, 1, 0], [], []>} : vector<8x16xf32>, vector<8x16xf32>, vector<8x8xf32> -> vector<8x8xf32>
    %cst_6 = arith.constant dense<0xFF800000> : vector<8xf32>
    %13 = vector.multi_reduction <maximumf>, %12, %cst_6 [1] : vector<8x8xf32> to vector<8xf32>
    %14 = vector.shape_cast %13 : vector<8xf32> to vector<8x1xf32>
    %15 = vector.broadcast %14 : vector<8x1xf32> to vector<8x8xf32>
    %16 = arith.subf %12, %15 : vector<8x8xf32>
    %17 = math.exp %16 : vector<8x8xf32>
    %cst_7 = arith.constant dense<0.000000e+00> : vector<8xf32>
    %18 = vector.multi_reduction <add>, %17, %cst_7 [1] : vector<8x8xf32> to vector<8xf32>
    %19 = vector.shape_cast %18 : vector<8xf32> to vector<8x1xf32>
    %20 = tpu.reciprocal %19 : vector<8x1xf32> -> vector<8x1xf32>
    %21 = vector.broadcast %20 : vector<8x1xf32> to vector<8x8xf32>
    %22 = arith.mulf %17, %21 : vector<8x8xf32>
    %cst_8 = arith.constant dense<0.000000e+00> : vector<8x16xf32>
    %23 = tpu.matmul %22, %11, %cst_8 {dimension_numbers = #tpu.dot_dimension_numbers<[1], [0], [0], [1], [0, 0, 1, 1], [], []>} : vector<8x8xf32>, vector<8x16xf32>, vector<8x16xf32> -> vector<8x16xf32>
    %c0_9 = arith.constant 0 : index
    %c0_10 = arith.constant 0 : index
    %24 = vector.load %arg15[%c0_9, %c0_10] : memref<8x32xf32, #tpu.memory_space<vmem>>, vector<8x16xf32>
    tpu.vector_store %arg15[%c0_9, %c0_10], %23 {strides = array<i32>} : memref<8x32xf32, #tpu.memory_space<vmem>>, vector<8x16xf32>,
    %25 = vector.extract_strided_slice %8 {offsets = [0, 16], sizes = [8, 16], strides = [1, 1]} : vector<8x32xf32> to vector<8x16xf32>
    %26 = vector.extract_strided_slice %4 {offsets = [0, 16], sizes = [8, 16], strides = [1, 1]} : vector<8x32xf32> to vector<8x16xf32>
    %27 = vector.extract_strided_slice %5 {offsets = [0, 16], sizes = [8, 16], strides = [1, 1]} : vector<8x32xf32> to vector<8x16xf32>
    %cst_11 = arith.constant dense<0.000000e+00> : vector<8x8xf32>
    %28 = tpu.matmul %25, %26, %cst_11 {dimension_numbers = #tpu.dot_dimension_numbers<[1], [1], [0], [0], [0, 0, 1, 0], [], []>} : vector<8x16xf32>, vector<8x16xf32>, vector<8x8xf32> -> vector<8x8xf32>
    %cst_12 = arith.constant dense<0xFF800000> : vector<8xf32>
    %29 = vector.multi_reduction <maximumf>, %28, %cst_12 [1] : vector<8x8xf32> to vector<8xf32>
    %30 = vector.shape_cast %29 : vector<8xf32> to vector<8x1xf32>
    %31 = vector.broadcast %30 : vector<8x1xf32> to vector<8x8xf32>
    %32 = arith.subf %28, %31 : vector<8x8xf32>
    %33 = math.exp %32 : vector<8x8xf32>
    %cst_13 = arith.constant dense<0.000000e+00> : vector<8xf32>
    %34 = vector.multi_reduction <add>, %33, %cst_13 [1] : vector<8x8xf32> to vector<8xf32>
    %35 = vector.shape_cast %34 : vector<8xf32> to vector<8x1xf32>
    %36 = tpu.reciprocal %35 : vector<8x1xf32> -> vector<8x1xf32>
    %37 = vector.broadcast %36 : vector<8x1xf32> to vector<8x8xf32>
    %38 = arith.mulf %33, %37 : vector<8x8xf32>
    %cst_14 = arith.constant dense<0.000000e+00> : vector<8x16xf32>
    %39 = tpu.matmul %38, %27, %cst_14 {dimension_numbers = #tpu.dot_dimension_numbers<[1], [0], [0], [1], [0, 0, 1, 1], [], []>} : vector<8x8xf32>, vector<8x16xf32>, vector<8x16xf32> -> vector<8x16xf32>
    %c0_15 = arith.constant 0 : index
    %c16 = arith.constant 16 : index
    %40 = vector.load %arg15[%c0_15, %c16] : memref<8x32xf32, #tpu.memory_space<vmem>>, vector<8x16xf32>
    tpu.vector_store %arg15[%c0_15, %c16], %39 {strides = array<i32>} : memref<8x32xf32, #tpu.memory_space<vmem>>, vector<8x16xf32>,
    %c0_16 = arith.constant 0 : index
    %c0_17 = arith.constant 0 : index
    %41 = vector.load %arg15[%c0_16, %c0_17] : memref<8x32xf32, #tpu.memory_space<vmem>>, vector<8x32xf32>
    %c0_18 = arith.constant 0 : index
    %c0_19 = arith.constant 0 : index
    %42 = vector.load %arg4[%c0_18, %c0_19] : memref<32x32xf32, #tpu.memory_space<vmem>>, vector<32x32xf32>
    %cst_20 = arith.constant dense<0.000000e+00> : vector<8x32xf32>
    %43 = tpu.matmul %41, %42, %cst_20 {dimension_numbers = #tpu.dot_dimension_numbers<[1], [0], [0], [1], [0, 0, 1, 1], [], []>} : vector<8x32xf32>, vector<32x32xf32>, vector<8x32xf32> -> vector<8x32xf32>
    %c0_21 = arith.constant 0 : index
    %c0_22 = arith.constant 0 : index
    %44 = vector.load %arg5[%c0_21, %c0_22] : memref<1x32xf32, #tpu.memory_space<vmem>>, vector<1x32xf32>
    %45 = vector.broadcast %44 : vector<1x32xf32> to vector<8x32xf32>
    %46 = arith.addf %43, %45 : vector<8x32xf32>
    %47 = arith.addf %46, %1 : vector<8x32xf32>
    %cst_23 = arith.constant dense<0.000000e+00> : vector<8xf32>
    %48 = vector.multi_reduction <add>, %47, %cst_23 [1] : vector<8x32xf32> to vector<8xf32>
    %49 = vector.shape_cast %48 : vector<8xf32> to vector<8x1xf32>
    %cst_24 = arith.constant 3.200000e+01 : f32
    %50 = vector.broadcast %cst_24 : f32 to vector<8x1xf32>
    %51 = arith.divf %49, %50 : vector<8x1xf32>
    %52 = vector.broadcast %51 : vector<8x1xf32> to vector<8x32xf32>
    %53 = arith.subf %47, %52 : vector<8x32xf32>
    %54 = arith.mulf %53, %53 : vector<8x32xf32>
    %cst_25 = arith.constant dense<0.000000e+00> : vector<8xf32>
    %55 = vector.multi_reduction <add>, %54, %cst_25 [1] : vector<8x32xf32> to vector<8xf32>
    %56 = vector.shape_cast %55 : vector<8xf32> to vector<8x1xf32>
    %cst_26 = arith.constant 3.200000e+01 : f32
    %57 = vector.broadcast %cst_26 : f32 to vector<8x1xf32>
    %58 = arith.divf %56, %57 : vector<8x1xf32>
    %59 = vector.broadcast %51 : vector<8x1xf32> to vector<8x32xf32>
    %60 = arith.subf %47, %59 : vector<8x32xf32>
    %cst_27 = arith.constant 9.99999974E-6 : f32
    %61 = vector.broadcast %cst_27 : f32 to vector<8x1xf32>
    %62 = arith.addf %58, %61 : vector<8x1xf32>
    %63 = math.rsqrt %62 : vector<8x1xf32>
    %64 = vector.broadcast %63 : vector<8x1xf32> to vector<8x32xf32>
    %65 = arith.mulf %60, %64 : vector<8x32xf32>
    %c0_28 = arith.constant 0 : index
    %c0_29 = arith.constant 0 : index
    %66 = vector.load %arg6[%c0_28, %c0_29] : memref<1x32xf32, #tpu.memory_space<vmem>>, vector<1x32xf32>
    %67 = vector.broadcast %66 : vector<1x32xf32> to vector<8x32xf32>
    %68 = arith.mulf %65, %67 : vector<8x32xf32>
    %c0_30 = arith.constant 0 : index
    %c0_31 = arith.constant 0 : index
    %69 = vector.load %arg7[%c0_30, %c0_31] : memref<1x32xf32, #tpu.memory_space<vmem>>, vector<1x32xf32>
    %70 = vector.broadcast %69 : vector<1x32xf32> to vector<8x32xf32>
    %71 = arith.addf %68, %70 : vector<8x32xf32>
    %c0_32 = arith.constant 0 : index
    %c0_33 = arith.constant 0 : index
    %72 = vector.load %arg8[%c0_32, %c0_33] : memref<32x128xf32, #tpu.memory_space<vmem>>, vector<32x128xf32>
    %cst_34 = arith.constant dense<0.000000e+00> : vector<8x128xf32>
    %73 = tpu.matmul %71, %72, %cst_34 {dimension_numbers = #tpu.dot_dimension_numbers<[1], [0], [0], [1], [0, 0, 1, 1], [], []>} : vector<8x32xf32>, vector<32x128xf32>, vector<8x128xf32> -> vector<8x128xf32>
    %c0_35 = arith.constant 0 : index
    %c0_36 = arith.constant 0 : index
    %74 = vector.load %arg9[%c0_35, %c0_36] : memref<1x128xf32, #tpu.memory_space<vmem>>, vector<1x128xf32>
    %75 = vector.broadcast %74 : vector<1x128xf32> to vector<8x128xf32>
    %76 = arith.addf %73, %75 : vector<8x128xf32>
    %cst_37 = arith.constant 0.000000e+00 : f32
    %77 = vector.broadcast %cst_37 : f32 to vector<8x128xf32>
    %78 = arith.maximumf %76, %77 : vector<8x128xf32>
    %c0_38 = arith.constant 0 : index
    %c0_39 = arith.constant 0 : index
    %79 = vector.load %arg10[%c0_38, %c0_39] : memref<128x32xf32, #tpu.memory_space<vmem>>, vector<128x32xf32>
    %cst_40 = arith.constant dense<0.000000e+00> : vector<8x32xf32>
    %80 = tpu.matmul %78, %79, %cst_40 {dimension_numbers = #tpu.dot_dimension_numbers<[1], [0], [0], [1], [0, 0, 1, 1], [], []>} : vector<8x128xf32>, vector<128x32xf32>, vector<8x32xf32> -> vector<8x32xf32>
    %c0_41 = arith.constant 0 : index
    %c0_42 = arith.constant 0 : index
    %81 = vector.load %arg11[%c0_41, %c0_42] : memref<1x32xf32, #tpu.memory_space<vmem>>, vector<1x32xf32>
    %82 = vector.broadcast %81 : vector<1x32xf32> to vector<8x32xf32>
    %83 = arith.addf %80, %82 : vector<8x32xf32>
    %84 = arith.addf %83, %71 : vector<8x32xf32>
    %cst_43 = arith.constant dense<0.000000e+00> : vector<8xf32>
    %85 = vector.multi_reduction <add>, %84, %cst_43 [1] : vector<8x32xf32> to vector<8xf32>
    %86 = vector.shape_cast %85 : vector<8xf32> to vector<8x1xf32>
    %cst_44 = arith.constant 3.200000e+01 : f32
    %87 = vector.broadcast %cst_44 : f32 to vector<8x1xf32>
    %88 = arith.divf %86, %87 : vector<8x1xf32>
    %89 = vector.broadcast %88 : vector<8x1xf32> to vector<8x32xf32>
    %90 = arith.subf %84, %89 : vector<8x32xf32>
    %91 = arith.mulf %90, %90 : vector<8x32xf32>
    %cst_45 = arith.constant dense<0.000000e+00> : vector<8xf32>
    %92 = vector.multi_reduction <add>, %91, %cst_45 [1] : vector<8x32xf32> to vector<8xf32>
    %93 = vector.shape_cast %92 : vector<8xf32> to vector<8x1xf32>
    %cst_46 = arith.constant 3.200000e+01 : f32
    %94 = vector.broadcast %cst_46 : f32 to vector<8x1xf32>
    %95 = arith.divf %93, %94 : vector<8x1xf32>
    %96 = vector.broadcast %88 : vector<8x1xf32> to vector<8x32xf32>
    %97 = arith.subf %84, %96 : vector<8x32xf32>
    %cst_47 = arith.constant 9.99999974E-6 : f32
    %98 = vector.broadcast %cst_47 : f32 to vector<8x1xf32>
    %99 = arith.addf %95, %98 : vector<8x1xf32>
    %100 = math.rsqrt %99 : vector<8x1xf32>
    %101 = vector.broadcast %100 : vector<8x1xf32> to vector<8x32xf32>
    %102 = arith.mulf %97, %101 : vector<8x32xf32>
    %c0_48 = arith.constant 0 : index
    %c0_49 = arith.constant 0 : index
    %103 = vector.load %arg12[%c0_48, %c0_49] : memref<1x32xf32, #tpu.memory_space<vmem>>, vector<1x32xf32>
    %104 = vector.broadcast %103 : vector<1x32xf32> to vector<8x32xf32>
    %105 = arith.mulf %102, %104 : vector<8x32xf32>
    %c0_50 = arith.constant 0 : index
    %c0_51 = arith.constant 0 : index
    %106 = vector.load %arg13[%c0_50, %c0_51] : memref<1x32xf32, #tpu.memory_space<vmem>>, vector<1x32xf32>
    %107 = vector.broadcast %106 : vector<1x32xf32> to vector<8x32xf32>
    %108 = arith.addf %105, %107 : vector<8x32xf32>
    %c0_52 = arith.constant 0 : index
    %c0_53 = arith.constant 0 : index
    %c0_54 = arith.constant 0 : index
    %109 = vector.load %arg14[%c0_52, %c0_53, %c0_54] : memref<1x8x32xf32, #tpu.memory_space<vmem>>, vector<1x8x32xf32>
    %110 = vector.shape_cast %109 : vector<1x8x32xf32> to vector<8x32xf32>
    %111 = vector.shape_cast %108 : vector<8x32xf32> to vector<1x8x32xf32>
    tpu.vector_store %arg14[%c0_52, %c0_53, %c0_54], %111 {strides = array<i32>} : memref<1x8x32xf32, #tpu.memory_space<vmem>>, vector<1x8x32xf32>,
    return
  }
  func.func @transform_0(%arg0: i32, %arg1: i32) -> (i32, i32, i32) {
    %c0_i32 = arith.constant 0 : i32
    %c0_i32_0 = arith.constant 0 : i32
    %c0_i32_1 = arith.constant 0 : i32
    return %arg0, %c0_i32, %c0_i32_0 : i32, i32, i32
  }
  func.func @transform_1(%arg0: i32, %arg1: i32) -> (i32, i32) {
    %c0_i32 = arith.constant 0 : i32
    %c0_i32_0 = arith.constant 0 : i32
    %c0_i32_1 = arith.constant 0 : i32
    return %c0_i32, %c0_i32_0 : i32, i32
  }
  func.func @transform_2(%arg0: i32, %arg1: i32) -> (i32, i32) {
    %c0_i32 = arith.constant 0 : i32
    %c0_i32_0 = arith.constant 0 : i32
    %c0_i32_1 = arith.constant 0 : i32
    return %c0_i32, %c0_i32_0 : i32, i32
  }
  func.func @transform_3(%arg0: i32, %arg1: i32) -> (i32, i32) {
    %c0_i32 = arith.constant 0 : i32
    %c0_i32_0 = arith.constant 0 : i32
    %c0_i32_1 = arith.constant 0 : i32
    return %c0_i32, %c0_i32_0 : i32, i32
  }
  func.func @transform_4(%arg0: i32, %arg1: i32) -> (i32, i32) {
    %c0_i32 = arith.constant 0 : i32
    %c0_i32_0 = arith.constant 0 : i32
    %c0_i32_1 = arith.constant 0 : i32
    return %c0_i32, %c0_i32_0 : i32, i32
  }
  func.func @transform_5(%arg0: i32, %arg1: i32) -> (i32, i32) {
    %c0_i32 = arith.constant 0 : i32
    %c0_i32_0 = arith.constant 0 : i32
    %c0_i32_1 = arith.constant 0 : i32
    return %c0_i32, %c0_i32_0 : i32, i32
  }
  func.func @transform_6(%arg0: i32, %arg1: i32) -> (i32, i32) {
    %c0_i32 = arith.constant 0 : i32
    %c0_i32_0 = arith.constant 0 : i32
    %c0_i32_1 = arith.constant 0 : i32
    return %c0_i32, %c0_i32_0 : i32, i32
  }
  func.func @transform_7(%arg0: i32, %arg1: i32) -> (i32, i32) {
    %c0_i32 = arith.constant 0 : i32
    %c0_i32_0 = arith.constant 0 : i32
    %c0_i32_1 = arith.constant 0 : i32
    return %c0_i32, %c0_i32_0 : i32, i32
  }
  func.func @transform_8(%arg0: i32, %arg1: i32) -> (i32, i32) {
    %c0_i32 = arith.constant 0 : i32
    %c0_i32_0 = arith.constant 0 : i32
    %c0_i32_1 = arith.constant 0 : i32
    return %c0_i32, %c0_i32_0 : i32, i32
  }
  func.func @transform_9(%arg0: i32, %arg1: i32) -> (i32, i32) {
    %c0_i32 = arith.constant 0 : i32
    %c0_i32_0 = arith.constant 0 : i32
    %c0_i32_1 = arith.constant 0 : i32
    return %c0_i32, %c0_i32_0 : i32, i32
  }
  func.func @transform_10(%arg0: i32, %arg1: i32) -> (i32, i32) {
    %c0_i32 = arith.constant 0 : i32
    %c0_i32_0 = arith.constant 0 : i32
    %c0_i32_1 = arith.constant 0 : i32
    return %c0_i32, %c0_i32_0 : i32, i32
  }
  func.func @transform_11(%arg0: i32, %arg1: i32) -> (i32, i32) {
    %c0_i32 = arith.constant 0 : i32
    %c0_i32_0 = arith.constant 0 : i32
    %c0_i32_1 = arith.constant 0 : i32
    return %c0_i32, %c0_i32_0 : i32, i32
  }
  func.func @transform_12(%arg0: i32, %arg1: i32) -> (i32, i32, i32) {
    %c0_i32 = arith.constant 0 : i32
    %c0_i32_0 = arith.constant 0 : i32
    return %arg0, %arg1, %c0_i32 : i32, i32, i32
  }
}

</mosaic_0001>

<bundles_post_ra>
// kernel: tpu_custom_call.1
= control target key start
LH: loop header
LB: loop body
LE: loop exit
PB: predicated region body
PF: predicated region fallthrough
CT: control target
= control target key end

     0   :  { %s2998_s0 = inlined_call_operand.hbm [shape: f32[2,8,32], index: 0, kind: input, shape index: {}]   ;;  %s2999_s1 = inlined_call_operand.hbm [shape: f32[32,96], index: 1, kind: input, shape index: {}]   ;;  %s3000_s2 = inlined_call_operand.hbm [shape: f32[32,32], index: 2, kind: input, shape index: {}]   ;;  %s3001_s3 = inlined_call_operand.hbm [shape: f32[1,32], index: 3, kind: input, shape index: {}]   ;;  %s3002_s4 = inlined_call_operand.hbm [shape: f32[1,32], index: 4, kind: input, shape index: {}]   ;;  %s3003_s5 = inlined_call_operand.hbm [shape: f32[1,32], index: 5, kind: input, shape index: {}]   ;;  %s3004_s6 = inlined_call_operand.hbm [shape: f32[32,128], index: 6, kind: input, shape index: {}]   ;;  %s3005_s7 = inlined_call_operand.hbm [shape: f32[1,128], index: 7, kind: input, shape index: {}]   ;;  %s3006_s8 = inlined_call_operand.hbm [shape: f32[128,32], index: 8, kind: input, shape index: {}]   ;;  %s3007_s9 = inlined_call_operand.hbm [shape: f32[1,32], index: 9, kind: input, shape index: {}]   ;;  %s3008_s10 = inlined_call_operand.hbm [shape: f32[1,32], index: 10, kind: input, shape index: {}]   ;;  %s3009_s11 = inlined_call_operand.hbm [shape: f32[1,32], index: 11, kind: input, shape index: {}]   ;;  %s3010_s12 = inlined_call_operand.hbm [shape: f32[2,8,32], index: 12, kind: output, shape index: {}]  }
   0x1   :  { %3025 = sst [smem:[#allocation36_spill]] %s2998_s0 }
   0x2   :  { %3026 = sst [smem:[#allocation37_spill]] %s2999_s1 }
   0x3   :  { %3027 = sst [smem:[#allocation38_spill]] %s3000_s2 }
   0x4   :  { %3028 = sst [smem:[#allocation39_spill]] %s3001_s3 }
   0x5   :  { %3029 = sst [smem:[#allocation40_spill]] %s3010_s12 }
   0x6   :  { %17 = vsyncpa [#allocation4], 0 }
   0x7   :  { %19 = vsyncpa [#allocation4 + $0x1], 0 }
   0x8   :  { %20 = vsyncpa [#allocation7], 0 }
   0x9   :  { %21 = vsyncpa [#allocation10], 0 }
   0xa   :  { %22 = vsyncpa [#allocation13], 0 }
   0xb   :  { %23 = vsyncpa [#allocation16], 0 }
   0xc   :  { %24 = vsyncpa [#allocation19], 0 }
   0xd   :  { %25 = vsyncpa [#allocation22], 0 }
   0xe   :  { %26 = vsyncpa [#allocation5], 0 }
   0xf   :  { %28 = vsyncpa [#allocation5 + $0x1], 0  ;;  %s2484_s21 = smov 0   ;;  %s2486_s22 = smov 0  }
  0x10   :  { %s2488_s23 = smov 0   ;;  %s2490_s24 = smov 0  }
  0x11   :  { %s2492_s25 = smov 0   ;;  %s2494_s26 = smov 0  }
  0x12 LB: > { %3030 = sst [smem:[#allocation32_spill]] %s2373_s21  ;;  %s3011_s27 = sadd.s32 4294967295, %s2393_s26   ;;  %s2393_s26 = sphi %s2494_s26, %s34_s26   ;;  %s2389_s25 = sphi %s2492_s25, %s3068_s25   ;;  %s2385_s24 = sphi %s2490_s24, %s3067_s24   ;;  %s2381_s23 = sphi %s2488_s23, %s3066_s23   ;;  %s2377_s22 = sphi %s2486_s22, %s3065_s22   ;;  %s2373_s21 = sphi %s2484_s21, %s3064_s21  }
  0x13   : > { %3031 = sst [smem:[#allocation33_spill]] %s2385_s24  ;;  %p1534_p0 = scmp.ge.s32.totalorder %s2393_s26, 1 }
  0x14   : > { %p2518_p1 = scmp.eq.s32.totalorder %s3011_s27, 0  ;;  %p336_p2 = scmp.lt.s32.totalorder %s2393_s26, 3 }
  0x15   : > { %s2395_s30 = smov [#allocation6]   ;;  %s2396_s15 = smov [#allocation9]  }
  0x16   : > { %s3032_s28 = scalar_select %p2518_p1, 1, 0 }
  0x17   : > { %p2523_p3 = pnand %p1534_p0, %p336_p2  ;;  %s348_s13 = sshll.u32 %s2395_s30, 4  ;;  %s2527_s13 = int_to_ptr.vmem [resolvable:$true] %s348_s13 }
  0x18   : > { %3033 = sst [smem:[#allocation34_spill]] %s3032_s28  ;;  %s375_s16 = sshll.u32 %s2396_s15, 4  ;;  %s2538_s16 = int_to_ptr.vmem [resolvable:$true] %s375_s16 }
  0x19   : > { %s3034_s29 = scalar_select %p2523_p3, 1, 0 }
  0x1a   : > { %p1801_p4 = pneg %p2523_p3  ;;  %s2397_s17 = smov [#allocation12]  }
  0x1b   : > { %3035 = sst [smem:[#allocation35_spill]] %s3034_s29  ;;  %s2540_s18 = sshll.u32 %s2397_s17, 4  ;;  %s398_s18 = int_to_ptr.vmem [resolvable:$true] %s2540_s18 }
  0x1c   : > { %p2534_p6 = pnand %p1801_p4, %p2518_p1  ;;  %s3037_s1 = sld [smem:[#allocation37_spill]] }
  0x1e   : > { %p2550_p8 = pneg %p2534_p6 }
  0x22   : > { %s1949_s30 = scalar_lea.hbm %s3037_s1, 512 }
  0x23   : > { %p1950_p7 = scmp.ne.s32.totalorder %s3037_s1, %s1949_s30  ;;  %p1956_p11 = scmp.lt.u32.totalorder %s1949_s30, %s3037_s1 }
  0x25   : > { %p1952_p9 = pnand %p2550_p8, %p1950_p7 }
  0x27   : > { %p1953_p10 = pneg %p1952_p9 }
  0x29   : > { %p1958_p12 = pnand %p1956_p11, %p1953_p10 }
  0x2b   : > { %1961 = shalt.err (!%p1958_p12)
}
  0x2c   : > { %s1962_s12 = scalar_lea.vmem %s2527_s13, 512  ;;  %p1970_p4 = scmp.lt.s32.totalorder %s2527_s13, %s2527_s13 }
  0x2d   : > { %p1963_p13 = scmp.ne.s32.totalorder %s2527_s13, %s1962_s12  ;;  %p1971_p5 = scmp.lt.s32.totalorder %s1962_s12, %s1962_s12 }
  0x2f   : > { %p1965_p0 = pnand %p1963_p13, %p2550_p8  ;;  %p1972_p7 = por %p1971_p5, %p1970_p4 }
  0x31   : > { %p1966_p2 = pneg %p1965_p0 }
  0x33   : > { %p1973_p9 = pnand %p1972_p7, %p1966_p2 }
  0x35   : > { %1976 = shalt.err (!%p1973_p9)
}
  0x36   : > { %s3020_s27 = smov 128   ;;  %s3022_s19 = smov 8  }
  0x37   : > { %1804 = dma.hbm_to_vmem [thread:$0]  (!%p2534_p6), %s3037_s1, 512, %s2527_s13, [#allocation7], %s3020_s27, %s3020_s27, %s3022_s19  }
  0x38   : > { %s3039_s3 = sld [smem:[#allocation39_spill]] }
  0x3e   : > { %s1977_s12 = scalar_lea.hbm %s3039_s3, 16 }
  0x3f   : > { %p1978_p5 = scmp.ne.s32.totalorder %s3039_s3, %s1977_s12  ;;  %p1984_p12 = scmp.lt.u32.totalorder %s1977_s12, %s3039_s3 }
  0x41   : > { %p1980_p10 = pnand %p1978_p5, %p2550_p8 }
  0x43   : > { %p1981_p11 = pneg %p1980_p10 }
  0x45   : > { %p1986_p13 = pnand %p1984_p12, %p1981_p11 }
  0x47   : > { %1989 = shalt.err (!%p1986_p13)
}
  0x48   : > { %s1990_s13 = scalar_lea.vmem %s2538_s16, 16  ;;  %s1997_s0 = scalar_lea.vmem %s2538_s16, 32 }
  0x49   : > { %p1991_p0 = scmp.ne.s32.totalorder %s2538_s16, %s1990_s13  ;;  %p1998_p7 = scmp.lt.s32.totalorder %s2538_s16, %s2538_s16 }
  0x4a   : > { %p1999_p9 = scmp.lt.s32.totalorder %s1997_s0, %s1990_s13 }
  0x4b   : > { %p1993_p2 = pnand %p1991_p0, %p2550_p8 }
  0x4c   : > { %p2000_p5 = por %p1999_p9, %p1998_p7 }
  0x4d   : > { %p1994_p4 = pneg %p1993_p2 }
  0x4f   : > { %p2001_p10 = pnand %p2000_p5, %p1994_p4 }
  0x51   : > { %2004 = shalt.err (!%p2001_p10)
}
  0x52   : > { %1810 = dma.hbm_to_vmem [thread:$0]  (!%p2534_p6), %s3039_s3, 16, %s2538_s16, [#allocation10]  }
  0x53   : > { %s2005_s30 = scalar_lea.hbm %s3003_s5, 16 }
  0x54   : > { %p2006_p11 = scmp.ne.s32.totalorder %s3003_s5, %s2005_s30  ;;  %p2012_p0 = scmp.lt.u32.totalorder %s2005_s30, %s3003_s5 }
  0x56   : > { %p2008_p12 = pnand %p2006_p11, %p2550_p8 }
  0x58   : > { %p2009_p13 = pneg %p2008_p12 }
  0x5a   : > { %p2014_p2 = pnand %p2012_p0, %p2009_p13 }
  0x5c   : > { %2017 = shalt.err (!%p2014_p2)
}
  0x5d   : > { %s2018_s0 = scalar_lea.vmem %s398_s18, 16  ;;  %s2025_s16 = scalar_lea.vmem %s398_s18, 32 }
  0x5e   : > { %p2019_p4 = scmp.ne.s32.totalorder %s398_s18, %s2018_s0  ;;  %p2026_p5 = scmp.lt.s32.totalorder %s398_s18, %s398_s18 }
  0x5f   : > { %p2027_p10 = scmp.lt.s32.totalorder %s2025_s16, %s2018_s0 }
  0x60   : > { %p2021_p7 = pnand %p2019_p4, %p2550_p8 }
  0x61   : > { %p2028_p3 = por %p2027_p10, %p2026_p5 }
  0x62   : > { %p2022_p9 = pneg %p2021_p7 }
  0x64   : > { %p2029_p1 = pnand %p2028_p3, %p2022_p9 }
  0x66   : > { %2032 = shalt.err (!%p2029_p1)
}
  0x67   : > { %1816 = dma.hbm_to_vmem [thread:$0]  (!%p2534_p6), %s3003_s5, 16, %s398_s18, [#allocation13]  }
  0x68   : > { %s2400_s29 = smov [#allocation15]   ;;  %s2401_s30 = smov [#allocation18]  }
  0x69   : > { %s421_s20 = sshll.u32 %s2400_s29, 4  ;;  %s445_s15 = sshll.u32 %s2401_s30, 4  ;;  %s422_s20 = int_to_ptr.vmem [resolvable:$true] %s421_s20  ;;  %s446_s15 = int_to_ptr.vmem [resolvable:$true] %s445_s15 }
  0x6a   : > { %s2033_s13 = scalar_lea.hbm %s3005_s7, 16 }
  0x6b   : > { %p2034_p1 = scmp.ne.s32.totalorder %s3005_s7, %s2033_s13  ;;  %p2040_p12 = scmp.lt.u32.totalorder %s2033_s13, %s3005_s7 }
  0x6d   : > { %p2036_p3 = pnand %p2034_p1, %p2550_p8 }
  0x6f   : > { %p2037_p11 = pneg %p2036_p3 }
  0x71   : > { %p2042_p13 = pnand %p2040_p12, %p2037_p11 }
  0x73   : > { %2045 = shalt.err (!%p2042_p13)
}
  0x74   : > { %s2046_s18 = scalar_lea.vmem %s422_s20, 16  ;;  %s2053_s28 = scalar_lea.vmem %s422_s20, 32 }
  0x75   : > { %p2047_p0 = scmp.ne.s32.totalorder %s422_s20, %s2046_s18  ;;  %p2054_p7 = scmp.lt.s32.totalorder %s422_s20, %s422_s20 }
  0x76   : > { %p2055_p9 = scmp.lt.s32.totalorder %s2053_s28, %s2046_s18 }
  0x77   : > { %p2049_p2 = pnand %p2047_p0, %p2550_p8 }
  0x78   : > { %p2056_p5 = por %p2055_p9, %p2054_p7 }
  0x79   : > { %p2050_p4 = pneg %p2049_p2 }
  0x7b   : > { %p2057_p10 = pnand %p2056_p5, %p2050_p4 }
  0x7d   : > { %2060 = shalt.err (!%p2057_p10)
}
  0x7e   : > { %1822 = dma.hbm_to_vmem [thread:$0]  (!%p2534_p6), %s3005_s7, 16, %s422_s20, [#allocation16]  }
  0x7f   : > { %s2061_s12 = scalar_lea.hbm %s3007_s9, 16 }
  0x80   : > { %p2062_p1 = scmp.ne.s32.totalorder %s3007_s9, %s2061_s12  ;;  %p2068_p12 = scmp.lt.u32.totalorder %s2061_s12, %s3007_s9 }
  0x82   : > { %p2064_p3 = pnand %p2062_p1, %p2550_p8 }
  0x84   : > { %p2065_p11 = pneg %p2064_p3 }
  0x86   : > { %p2070_p13 = pnand %p2068_p12, %p2065_p11 }
  0x88   : > { %2073 = shalt.err (!%p2070_p13)
}
  0x89   : > { %s2074_s18 = scalar_lea.vmem %s446_s15, 16  ;;  %s2081_s20 = scalar_lea.vmem %s446_s15, 32 }
  0x8a   : > { %p2075_p0 = scmp.ne.s32.totalorder %s446_s15, %s2074_s18  ;;  %p2082_p7 = scmp.lt.s32.totalorder %s446_s15, %s446_s15 }
  0x8b   : > { %p2083_p9 = scmp.lt.s32.totalorder %s2081_s20, %s2074_s18 }
  0x8c   : > { %p2077_p2 = pnand %p2075_p0, %p2550_p8 }
  0x8d   : > { %p2084_p5 = por %p2083_p9, %p2082_p7 }
  0x8e   : > { %p2078_p4 = pneg %p2077_p2 }
  0x90   : > { %p2085_p10 = pnand %p2084_p5, %p2078_p4 }
  0x92   : > { %2088 = shalt.err (!%p2085_p10)
}
  0x93   : > { %1828 = dma.hbm_to_vmem [thread:$0]  (!%p2534_p6), %s3007_s9, 16, %s446_s15, [#allocation19]  }
  0x94   : > { %s2402_s30 = smov [#allocation8]   ;;  %s2403_s17 = smov [#allocation11]  }
  0x95   : > { %s361_s27 = sshll.u32 %s2402_s30, 4  ;;  %s386_s12 = sshll.u32 %s2403_s17, 4  ;;  %s362_s27 = int_to_ptr.vmem [resolvable:$true] %s361_s27  ;;  %s387_s12 = int_to_ptr.vmem [resolvable:$true] %s386_s12 }
  0x96   : > { %s3040_s2 = sld [smem:[#allocation38_spill]] }
  0x9c   : > { %s2089_s16 = scalar_lea.hbm %s3040_s2, 512 }
  0x9d   : > { %p2090_p1 = scmp.ne.s32.totalorder %s3040_s2, %s2089_s16  ;;  %p2096_p12 = scmp.lt.u32.totalorder %s2089_s16, %s3040_s2 }
  0x9f   : > { %p2092_p3 = pnand %p2090_p1, %p2550_p8 }
  0xa1   : > { %p2093_p11 = pneg %p2092_p3 }
  0xa3   : > { %p2098_p13 = pnand %p2096_p12, %p2093_p11 }
  0xa5   : > { %2101 = shalt.err (!%p2098_p13)
}
  0xa6   : > { %s2102_s15 = scalar_lea.vmem %s362_s27, 512  ;;  %p2110_p7 = scmp.lt.s32.totalorder %s362_s27, %s362_s27 }
  0xa7   : > { %p2103_p0 = scmp.ne.s32.totalorder %s362_s27, %s2102_s15  ;;  %p2111_p9 = scmp.lt.s32.totalorder %s2102_s15, %s2102_s15 }
  0xa9   : > { %p2105_p2 = pnand %p2103_p0, %p2550_p8  ;;  %p2112_p5 = por %p2111_p9, %p2110_p7 }
  0xab   : > { %p2106_p4 = pneg %p2105_p2 }
  0xad   : > { %p2113_p10 = pnand %p2112_p5, %p2106_p4 }
  0xaf   : > { %2116 = shalt.err (!%p2113_p10)
}
  0xb0   : > { %s3041_s29 = smov 128   ;;  %s2117_s16 = scalar_lea.hbm %s3002_s4, 16 }
  0xb1   : > { %1807 = dma.hbm_to_vmem [thread:$0]  (!%p2534_p6), %s3040_s2, 512, %s362_s27, [#allocation7], %s3041_s29, %s3041_s29, %s3022_s19  }
  0xb2   : > { %p2118_p1 = scmp.ne.s32.totalorder %s3002_s4, %s2117_s16  ;;  %p2124_p12 = scmp.lt.u32.totalorder %s2117_s16, %s3002_s4 }
  0xb4   : > { %p2120_p3 = pnand %p2118_p1, %p2550_p8 }
  0xb6   : > { %p2121_p11 = pneg %p2120_p3 }
  0xb8   : > { %p2126_p13 = pnand %p2124_p12, %p2121_p11 }
  0xba   : > { %2129 = shalt.err (!%p2126_p13)
}
  0xbb   : > { %s2130_s15 = scalar_lea.vmem %s387_s12, 16  ;;  %s2137_s27 = scalar_lea.vmem %s387_s12, 32 }
  0xbc   : > { %p2131_p0 = scmp.ne.s32.totalorder %s387_s12, %s2130_s15  ;;  %p2138_p7 = scmp.lt.s32.totalorder %s387_s12, %s387_s12 }
  0xbd   : > { %p2139_p9 = scmp.lt.s32.totalorder %s2137_s27, %s2130_s15 }
  0xbe   : > { %p2133_p2 = pnand %p2131_p0, %p2550_p8 }
  0xbf   : > { %p2140_p5 = por %p2139_p9, %p2138_p7 }
  0xc0   : > { %p2134_p4 = pneg %p2133_p2 }
  0xc2   : > { %p2141_p10 = pnand %p2140_p5, %p2134_p4 }
  0xc4   : > { %2144 = shalt.err (!%p2141_p10)
}
  0xc5   : > { %1813 = dma.hbm_to_vmem [thread:$0]  (!%p2534_p6), %s3002_s4, 16, %s387_s12, [#allocation10]  }
  0xc6   : > { %s2404_s13 = smov [#allocation14]   ;;  %s2405_s16 = smov [#allocation17]  }
  0xc7   : > { %s407_s0 = sshll.u32 %s2404_s13, 4  ;;  %s431_s21 = sshll.u32 %s2405_s16, 4  ;;  %s408_s0 = int_to_ptr.vmem [resolvable:$true] %s407_s0  ;;  %s432_s21 = int_to_ptr.vmem [resolvable:$true] %s431_s21 }
  0xc8   : > { %s2145_s28 = scalar_lea.hbm %s3004_s6, 512 }
  0xc9   : > { %p2146_p1 = scmp.ne.s32.totalorder %s3004_s6, %s2145_s28  ;;  %p2152_p12 = scmp.lt.u32.totalorder %s2145_s28, %s3004_s6 }
  0xcb   : > { %p2148_p3 = pnand %p2146_p1, %p2550_p8 }
  0xcd   : > { %p2149_p11 = pneg %p2148_p3 }
  0xcf   : > { %p2154_p13 = pnand %p2152_p12, %p2149_p11 }
  0xd1   : > { %2157 = shalt.err (!%p2154_p13)
}
  0xd2   : > { %s2158_s12 = scalar_lea.vmem %s408_s0, 512  ;;  %p2166_p7 = scmp.lt.s32.totalorder %s408_s0, %s408_s0 }
  0xd3   : > { %p2159_p0 = scmp.ne.s32.totalorder %s408_s0, %s2158_s12  ;;  %p2167_p9 = scmp.lt.s32.totalorder %s2158_s12, %s2158_s12 }
  0xd5   : > { %p2161_p2 = pnand %p2159_p0, %p2550_p8  ;;  %p2168_p5 = por %p2167_p9, %p2166_p7 }
  0xd7   : > { %p2162_p4 = pneg %p2161_p2 }
  0xd9   : > { %p2169_p10 = pnand %p2168_p5, %p2162_p4 }
  0xdb   : > { %2172 = shalt.err (!%p2169_p10)
}
  0xdc   : > { %s3042_s17 = smov 8   ;;  %s2173_s20 = scalar_lea.hbm %s3006_s8, 2048 }
  0xdd   : > { %1819 = dma.hbm_to_vmem [thread:$0]  (!%p2534_p6), %s3004_s6, 512, %s408_s0, [#allocation13], %s3041_s29, %s3041_s29, %s3042_s17  }
  0xde   : > { %p2174_p1 = scmp.ne.s32.totalorder %s3006_s8, %s2173_s20  ;;  %p2180_p12 = scmp.lt.u32.totalorder %s2173_s20, %s3006_s8 }
  0xe0   : > { %p2176_p3 = pnand %p2174_p1, %p2550_p8 }
  0xe2   : > { %p2177_p11 = pneg %p2176_p3 }
  0xe4   : > { %p2182_p13 = pnand %p2180_p12, %p2177_p11 }
  0xe6   : > { %2185 = shalt.err (!%p2182_p13)
}
  0xe7   : > { %s2186_s12 = scalar_lea.vmem %s432_s21, 2048  ;;  %p2194_p7 = scmp.lt.s32.totalorder %s432_s21, %s432_s21 }
  0xe8   : > { %p2187_p0 = scmp.ne.s32.totalorder %s432_s21, %s2186_s12  ;;  %p2195_p9 = scmp.lt.s32.totalorder %s2186_s12, %s2186_s12 }
  0xea   : > { %p2189_p2 = pnand %p2187_p0, %p2550_p8  ;;  %p2196_p5 = por %p2195_p9, %p2194_p7 }
  0xec   : > { %p2190_p4 = pneg %p2189_p2 }
  0xee   : > { %p2197_p10 = pnand %p2196_p5, %p2190_p4 }
  0xf0   : > { %2200 = shalt.err (!%p2197_p10)
}
  0xf1   : > { %1825 = dma.hbm_to_vmem [thread:$0]  (!%p2534_p6), %s3006_s8, 2048, %s432_s21, [#allocation16], %s3041_s29, %s3041_s29, %s3042_s17  }
  0xf2   : > { %s2406_s13 = smov [#allocation20]   ;;  %s2407_s18 = smov [#allocation21]  }
  0xf3   : > { %s456_s16 = sshll.u32 %s2406_s13, 4  ;;  %s467_s20 = sshll.u32 %s2407_s18, 4  ;;  %s457_s16 = int_to_ptr.vmem [resolvable:$true] %s456_s16  ;;  %s468_s20 = int_to_ptr.vmem [resolvable:$true] %s467_s20 }
  0xf4   : > { %s2201_s27 = scalar_lea.hbm %s3008_s10, 16 }
  0xf5   : > { %p2202_p1 = scmp.ne.s32.totalorder %s3008_s10, %s2201_s27  ;;  %p2208_p12 = scmp.lt.u32.totalorder %s2201_s27, %s3008_s10 }
  0xf7   : > { %p2204_p3 = pnand %p2202_p1, %p2550_p8 }
  0xf9   : > { %p2205_p11 = pneg %p2204_p3 }
  0xfb   : > { %p2210_p13 = pnand %p2208_p12, %p2205_p11 }
  0xfd   : > { %2213 = shalt.err (!%p2210_p13)
}
  0xfe   : > { %s2214_s29 = scalar_lea.vmem %s457_s16, 16  ;;  %s2221_s21 = scalar_lea.vmem %s457_s16, 32 }
  0xff   : > { %p2215_p0 = scmp.ne.s32.totalorder %s457_s16, %s2214_s29  ;;  %p2222_p7 = scmp.lt.s32.totalorder %s457_s16, %s457_s16 }
 0x100   : > { %p2223_p9 = scmp.lt.s32.totalorder %s2221_s21, %s2214_s29 }
 0x101   : > { %p2217_p2 = pnand %p2215_p0, %p2550_p8 }
 0x102   : > { %p2224_p5 = por %p2223_p9, %p2222_p7 }
 0x103   : > { %p2218_p4 = pneg %p2217_p2 }
 0x105   : > { %p2225_p10 = pnand %p2224_p5, %p2218_p4 }
 0x107   : > { %2228 = shalt.err (!%p2225_p10)
}
 0x108   : > { %1831 = dma.hbm_to_vmem [thread:$0]  (!%p2534_p6), %s3008_s10, 16, %s457_s16, [#allocation19]  }
 0x109   : > { %s2229_s18 = scalar_lea.hbm %s3009_s11, 16 }
 0x10a   : > { %p2230_p1 = scmp.ne.s32.totalorder %s3009_s11, %s2229_s18  ;;  %p2236_p12 = scmp.lt.u32.totalorder %s2229_s18, %s3009_s11 }
 0x10c   : > { %p2232_p3 = pnand %p2230_p1, %p2550_p8 }
 0x10e   : > { %p2233_p11 = pneg %p2232_p3 }
 0x110   : > { %p2238_p13 = pnand %p2236_p12, %p2233_p11 }
 0x112   : > { %2241 = shalt.err (!%p2238_p13)
}
 0x113   : > { %s2242_s12 = scalar_lea.vmem %s468_s20, 16  ;;  %s2249_s16 = scalar_lea.vmem %s468_s20, 32 }
 0x114   : > { %p2243_p0 = scmp.ne.s32.totalorder %s468_s20, %s2242_s12  ;;  %p2250_p7 = scmp.lt.s32.totalorder %s468_s20, %s468_s20 }
 0x115   : > { %p2251_p9 = scmp.lt.s32.totalorder %s2249_s16, %s2242_s12 }
 0x116   : > { %p2245_p2 = pnand %p2243_p0, %p2550_p8 }
 0x117   : > { %p2252_p5 = por %p2251_p9, %p2250_p7 }
 0x118   : > { %p2246_p4 = pneg %p2245_p2 }
 0x11a   : > { %p2253_p10 = pnand %p2252_p5, %p2246_p4 }
 0x11c   : > { %2256 = shalt.err (!%p2253_p10)
}
 0x11d   : > { %s3043_s24 = sld [smem:[#allocation32_spill]]  ;;  %s3044_s21 = sld [smem:[#allocation34_spill]] }
 0x11e   : > { %1834 = dma.hbm_to_vmem [thread:$0]  (!%p2534_p6), %s3009_s11, 16, %s468_s20, [#allocation22]  }
 0x11f   : > { %s1533_s17 = sadd.s32 4294967294, %s2393_s26   ;;  %s46_s19 = sadd.s32 1, %s2389_s25 }
 0x120   : > { %s53_s14 = sadd.s32 1, %s2381_s23  ;;  %p48_p8 = scmp.ge.s32.totalorder %s46_s19, 2 }
 0x121   : > { %p60_p1 = scmp.ne.s32.totalorder %s2381_s23, %s2377_s22  ;;  %p61_p3 = scmp.eq.s32.totalorder %s2393_s26, 0 }
 0x122   : > { %s3070_s19 = smov (%p48_p8, %s46_s19), 0  ;;  %s3048_s18 = sadd.s32 4294967295, %s2393_s26  }
 0x123   : > { %p66_p11 = scmp.ne.s32.totalorder %s2377_s22, %s3043_s24  ;;  %p2780_p12 = por %p61_p3, %p60_p1 }
 0x124   : > { %p3046_p13 = scmp.ne.s32.totalorder %s3044_s21, 0  ;;  %s50_s13 = ssub.s32 %s2389_s25, %s3070_s19 }
 0x125   : > { %p323_p0 = scmp.eq.s32.totalorder %s3048_s18, 1  ;;  %p51_p2 = scmp.eq.s32.totalorder %s50_s13, 0 }
 0x126   : > { %p2786_p6 = por %p3046_p13, %p66_p11  ;;  %p329_p4 = scmp.eq.s32.totalorder %s1533_s17, 1 }
 0x127   : > { %p2794_p7 = por %p323_p0, %p60_p1  ;;  %p1854_p9 = scmp.lt.s32.totalorder %s2393_s26, 2 }
 0x128   : > { %s2800_s15 = scalar_select %p51_p2, %s2381_s23, %s53_s14  }
 0x129   : > { %s3049_s28 = scalar_select %p2794_p7, 1, 0 }
 0x12a   : > { %p2802_p5 = por %p329_p4, %p66_p11  ;;  %s478_s30 = sand.u32 1, %s2381_s23  }
 0x12b   : > { %s1547_s12 = sshll.u32 %s478_s30, 3  ;;  %s1548_s16 = sshll.u32 %s2389_s25, 7 }
 0x12c   : > { %s3050_s27 = scalar_select %p2802_p5, 1, 0 }
 0x12d   : > { %s3051_s24 = sld [smem:[#allocation36_spill]]  ;;  %s482_s17 = scalar_lea.vmem [#allocation3], %s1547_s12 }
 0x12e   : > { %s489_s13 = sshll.u32 %s482_s17, 4  ;;  %p2817_p10 = pnand %p1854_p9, %p2780_p12  ;;  %s2813_s13 = int_to_ptr.vmem [resolvable:$true] %s489_s13 }
 0x12f   : > { %s479_s18 = scalar_lea.sflag [#allocation4], %s478_s30 }
 0x130   : > { %p2259_p1 = pneg %p2817_p10 }
 0x133   : > { %s3052_s2 = smov %s3051_s24  ;;  %s2811_s21 = scalar_lea.hbm %s3051_s24, %s1548_s16 }
 0x134   : > { %s2257_s3 = scalar_lea.hbm %s2811_s21, 128  ;;  %s2262_s0 = scalar_lea.hbm %s3052_s2, 256 }
 0x135   : > { %p2258_p8 = scmp.ne.s32.totalorder %s2811_s21, %s2257_s3  ;;  %p2263_p12 = scmp.lt.u32.totalorder %s2811_s21, %s3052_s2 }
 0x136   : > { %p2264_p13 = scmp.lt.u32.totalorder %s2262_s0, %s2257_s3  ;;  %p2266_p2 = scmp.lt.u32.totalorder %s2257_s3, %s2811_s21 }
 0x137   : > { %p2260_p3 = pnand %p2259_p1, %p2258_p8 }
 0x138   : > { %p2265_p0 = por %p2264_p13, %p2263_p12 }
 0x139   : > { %p2261_p11 = pneg %p2260_p3 }
 0x13a   : > { %p2267_p4 = por %p2266_p2, %p2265_p0 }
 0x13c   : > { %p2268_p9 = pnand %p2267_p4, %p2261_p11 }
 0x13e   : > { %2271 = shalt.err (!%p2268_p9)
}
 0x13f   : > { %s2272_s30 = scalar_lea.vmem %s2813_s13, 128  ;;  %s2408_s24 = smov [#allocation3]  }
 0x140   : > { %p2273_p8 = scmp.ne.s32.totalorder %s2813_s13, %s2272_s30  ;;  %s2277_s17 = sshll.u32 %s2408_s24, 4  ;;  %s2278_s17 = int_to_ptr.vmem [resolvable:$false] %s2277_s17 }
 0x141   : > { %s2279_s12 = scalar_lea.vmem %s2278_s17, 256  ;;  %p2280_p7 = scmp.lt.s32.totalorder %s2813_s13, %s2278_s17 }
 0x142   : > { %p2275_p3 = pnand %p2273_p8, %p2259_p1  ;;  %p2281_p12 = scmp.lt.s32.totalorder %s2279_s12, %s2272_s30 }
 0x144   : > { %p2276_p5 = pneg %p2275_p3  ;;  %p2282_p13 = por %p2281_p12, %p2280_p7 }
 0x146   : > { %p2283_p0 = pnand %p2282_p13, %p2276_p5 }
 0x148   : > { %2286 = shalt.err (!%p2283_p0)
}
 0x149   : > { %1838 = dma.hbm_to_vmem [thread:$0]  (!%p2817_p10), %s2811_s21, 128, %s2813_s13, %s479_s18  }
 0x14a   : > { %s3054_s3 = sld [smem:[#allocation35_spill]] }
 0x150   : > { %p3055_p11 = scmp.ne.s32.totalorder %s3054_s3, 0 }
 0x151   : > { %s2849_s16 = sand.u32 (!%p3055_p11), 1, %s2377_s22  }
 0x152   : > { %498 = sbr.rel (%p3055_p11) target bundleno = 2861 (0xb2d), region = 68  ;;  %s1550_s0 = sshll.u32 (!%p3055_p11), %s2849_s16, 3 }
 0x153   : > { %s501_s1 = scalar_lea.sflag (!%p3055_p11), [#allocation4], %s2849_s16  ;;  %s2855_s29 = scalar_lea.vmem (!%p3055_p11), [#allocation3], %s1550_s0 }
 0x159   : > { %2340 = dma.done.wait (%p2786_p6), %s501_s1, 128  }
 0x15a   : > { %2342 = vsyncadd (%p2786_p6), %s501_s1, 4294967168  ;;  %s3056_s21 = sld [smem:[#allocation34_spill]] }
 0x160   : > { %p3057_p7 = scmp.ne.s32.totalorder %s3056_s21, 0 }
 0x162   : > { %2344 = dma.done.wait (%p3057_p7), [#allocation7], 1024  }
 0x163   : > { %2346 = vsyncadd (%p3057_p7), [#allocation7], 4294966272 }
 0x164   : > { %2348 = dma.done.wait (%p3057_p7), [#allocation10], 32  }
 0x165   : > { %2350 = vsyncadd (%p3057_p7), [#allocation10], 4294967264 }
 0x166   : > { %2352 = dma.done.wait (%p3057_p7), [#allocation13], 528  }
 0x167   : > { %2354 = vsyncadd (%p3057_p7), [#allocation13], 4294966768 }
 0x168   : > { %2356 = dma.done.wait (%p3057_p7), [#allocation16], 2064  }
 0x169   : > { %2358 = vsyncadd (%p3057_p7), [#allocation16], 4294965232 }
 0x16a   : > { %2360 = dma.done.wait (%p3057_p7), [#allocation19], 32  }
 0x16b   : > { %2362 = vsyncadd (%p3057_p7), [#allocation19], 4294967264 }
 0x16c   : > { %2364 = dma.done.wait (%p3057_p7), [#allocation22], 16  }
 0x16d   : > { %2366 = vsyncadd (%p3057_p7), [#allocation22], 4294967280  ;;  %v2409_v0 = vmov 0.0|0.0   ;;  %vm2410_vm0 = vmmov 0   ;;  %v2411_v1 = vmov 0.0   ;;  %v590_v2 = vld [vmem:[#allocation6] sm:$0xff] }
 0x16e   : > { %1711 = vmatprep.subr.bf16.mxu1 %v2409_v0  ;;  %1631 = vmatprep.mubr.msk.f32.mxu1 %vm2410_vm0, %v2411_v1  ;;  %v591_v3 = vld [vmem:[#allocation6 + $0x8] sm:$0xff]  ;;  %v592_v4 = vld [vmem:[#allocation6 + $0x10] sm:$0xff]  ;;  %v593_v6 = vld [vmem:[#allocation6 + $0x18] sm:$0xff]  ;;  %vm594_vm1 = vcmask 261120   ;;  %vm672_vm2 = vcmask 130048   ;;  %s2412_s20 = smov 48  }
 0x16f   : > { %1644 = vmatprep.subr.mxu0 %v2411_v1  ;;  %1646 = vmatprep.mubr.msk.f32.mxu0 %vm2410_vm0, %v2411_v1  ;;  %v1712_v5 = vpack.c.bf16 %v591_v3, %v590_v2  ;;  %v1715_v7 = vpack.c.bf16 %v593_v6, %v592_v4  ;;  %v2893_v8 = vld [vmem:[%s2855_s29] sm:$0xff]  ;;  %s2413_s13 = smov 64   ;;  %s2414_s14 = smov 112   ;;  %vm748_vm3 = vcmask 64512   ;;  %v1009_v39 = vld [vmem:[#allocation8] sm:$0xff]  ;;  %v1010_v40 = vld [vmem:[#allocation8 + $0x8] sm:$0xff] }
 0x170   : > { %s2415_s18 = smov 96   ;;  %s2416_s30 = smov 80   ;;  %v1718_v41 = vpack.c.bf16 %v1010_v40, %v1009_v39  ;;  %v1011_v42 = vld [vmem:[#allocation8 + $0x10] sm:$0xff]  ;;  %v1012_v43 = vld [vmem:[#allocation8 + $0x18] sm:$0xff]  ;;  %vm1006_vm4 = vcmask 261248   ;;  %v1124_v62 = vld [vmem:[#allocation14] sm:$0xff] }
 0x171   : > { %1713 = vmatpush3.bf16.msra.mxu1 %v1712_v5  ;;  %v1721_v44 = vpack.c.bf16 %v1012_v43, %v1011_v42  ;;  %s2417_s24 = smov 16   ;;  %v1570_v51 = vld [vmem:[#allocation9] ss:$0 sm:$0xff]  ;;  %v1125_v63 = vld [vmem:[#allocation14 + $0x8] sm:$0xff]  ;;  %v1576_v42 = vld [vmem:[#allocation18] ss:$0 sm:$0xff] }
 0x172   : > { %1714 = vmatprep.subr.bf16.mxu1 %v2409_v0  ;;  %v1724_v2 = vpack.c.bf16 %v1125_v63, %v1124_v62  ;;  %v1127_v3 = vld [vmem:[#allocation14 + $0x18] sm:$0xff]  ;;  %v1209_v5 = vld [vmem:[#allocation17] sm:$0xff]  ;;  %v1210_v6 = vld [vmem:[#allocation17 + $0x8] sm:$0xff]  ;;  %s3058_s17 = sld [smem:[#allocation33_spill]]  ;;  %s588_s3 = scalar_lea.vmem [#allocation23], %s1550_s0 }
 0x173   : > { %s1348_s1 = sshll.u32 %s588_s3, 4  ;;  %p3060_p5 = scmp.ne.s32.totalorder %s3049_s28, 0  ;;  %s2950_s1 = int_to_ptr.vmem [resolvable:$true] %s1348_s1 }
 0x174   : > { %s2418_s0 = smov [#allocation23]  }
 0x175   : > { %1716 = vmatpush3.bf16.msra.mxu1 %v1715_v7  ;;  %v1211_v7 = vld [vmem:[#allocation17 + $0x10] sm:$0xff] }
 0x176   : > { %1634 = vmatprep.subr.mxu1 %v2411_v1 }
 0x178   : > { %1632 = vmatmul.mubr.msk.f32.vlgmr.msra.gmra.mrb[0].mxu1 %vm594_vm1, %v2893_v8  ;;  %s1580_s12 = sshll.u32 %s3058_s17, 7 }
 0x179   : > { %1636 = vmatprep.mubr.msk.f32.mxu1 %vm2410_vm0, %v2411_v1 }
 0x24b   : > { %v664_v9 = vpop.f32.mrb[0].mxu1 }
 0x24c   : > { %v1633_v10 = vpop.f32.mrb[1].mxu1  ;;  %1635 = vmatpush3.xpose.msk.msra.mxu1 %vm672_vm2, %v664_v9  ;;  %v668_v11 = vmul.f32 0.17677669, %v664_v9 }
 0x24d   : > { %1639 = vmatprep.subr.mxu1 %v2411_v1 }
 0x24e   : > { %837 = vrot.lane.b32.xlu1 %v668_v11, %s2412_s20  ;;  %670 = vrot.lane.b32.xlu0 %v668_v11, %s2413_s13  ;;  %v1213_v11 = vld [vmem:[#allocation17 + $0x20] sm:$0xff]  ;;  %s3059_s20 = sld [smem:[#allocation40_spill]] }
 0x252   : > { %839 = vrot.lane.b32.xlu0 %v664_v9, %s2414_s14  ;;  %s1334_s14 = scalar_lea.sflag [#allocation5], %s2849_s16 }
 0x254   : > { %s2948_s13 = scalar_lea.hbm %s3059_s20, %s1580_s12 }
 0x2c0   : > { %v671_v12 = vpop.permute.xlu0 %670  ;;  %v838_v14 = vpop.permute.xlu1 %837 }
 0x2c1   : > { %1637 = vmatmul.mubr.msk.f32.vlgmr.msra.gmra.mrb[2].mxu1 %vm672_vm2, %v671_v12  ;;  %v1214_v12 = vld [vmem:[#allocation17 + $0x28] sm:$0xff] }
 0x2c2   : > { %1641 = vmatprep.mubr.msk.f32.mxu1 %vm2410_vm0, %v2411_v1 }
 0x2c4   : > { %v840_v13 = vpop.permute.xlu0 %839 }
 0x2c5   : > { %1645 = vmatpush3.xpose.msk.msra.mxu0 %vm672_vm2, %v840_v13  ;;  %v1736_v13 = vpack.c.bf16 %v1214_v12, %v1213_v11 }
 0x2c6   : > { %1729 = vmatprep.subr.bf16.mxu0 %v2409_v0 }
 0x2c8   : > { %1647 = vmatmul.mubr.msk.f32.vlgmr.msra.gmra.mrb[0].mxu0 %vm672_vm2, %v838_v14  ;;  %v1215_v14 = vld [vmem:[#allocation17 + $0x30] sm:$0xff] }
 0x2c9   : > { %1708 = vmatprep.mubr.msk.f32.mxu0 %vm2410_vm0, %v2411_v1 }
 0x394   : > { %v744_v15 = vpop.f32.mrb[2].mxu1 }
 0x395   : > { %v1638_v16 = vpop.f32.mrb[3].mxu1  ;;  %v749_v17 = vsel %vm748_vm3, %v744_v15, -inf }
 0x396   : > { %750 = vmax.xlane.f32.xlu1 %v749_v17  ;;  %v1217_v17 = vld [vmem:[#allocation17 + $0x40] sm:$0xff] }
 0x39b   : > { %v911_v18 = vpop.f32.mrb[0].mxu0 }
 0x39c   : > { %v1648_v19 = vpop.f32.mrb[1].mxu0  ;;  %v915_v20 = vsel %vm748_vm3, %v911_v18, -inf }
 0x39d   : > { %916 = vmax.xlane.f32.xlu0 %v915_v20  ;;  %v1219_v20 = vld [vmem:[#allocation17 + $0x50] sm:$0xff] }
 0x423   : > { %v751_v21 = vpop.xlane.xlu1 %750 }
 0x424   : > { %v752_v22 = vsub.f32 %v744_v15, %v751_v21  ;;  %v1216_v15 = vld [vmem:[#allocation17 + $0x38] sm:$0xff] }
 0x425   : > { %v1739_v16 = vpack.c.bf16 %v1216_v15, %v1215_v14  ;;  %v1220_v21 = vld [vmem:[#allocation17 + $0x58] sm:$0xff] }
 0x426   : > { %v753_v23 = vmul.f32 1.442695, %v752_v22  ;;  %v1745_v22 = vpack.c.bf16 %v1220_v21, %v1219_v20 }
 0x428   : > { %1937 = vpow2.f32 %v753_v23  ;;  %v1221_v23 = vld [vmem:[#allocation17 + $0x60] sm:$0xff] }
 0x42a   : > { %v917_v24 = vpop.xlane.xlu0 %916 }
 0x42b   : > { %v918_v25 = vsub.f32 %v911_v18, %v917_v24  ;;  %v1218_v18 = vld [vmem:[#allocation17 + $0x48] sm:$0xff] }
 0x42c   : > { %v1742_v19 = vpack.c.bf16 %v1218_v18, %v1217_v17  ;;  %v1222_v24 = vld [vmem:[#allocation17 + $0x68] sm:$0xff] }
 0x42d   : > { %v919_v26 = vmul.f32 1.442695, %v918_v25  ;;  %v1748_v25 = vpack.c.bf16 %v1222_v24, %v1221_v23 }
 0x42f   : > { %1939 = vpow2.f32 %v919_v26 }
 0x432   : > { %v1938_v27 = vpop.eup %1937 }
 0x433   : > { %v755_v28 = vsel %vm748_vm3, %v1938_v27, 0.0 }
 0x434   : > { %756 = vadd.xlane.f32.xlu0 %v755_v28 }
 0x439   : > { %v1940_v29 = vpop.eup %1939 }
 0x43a   : > { %v921_v30 = vsel %vm748_vm3, %v1940_v29, 0.0 }
 0x43b   : > { %922 = vadd.xlane.f32.xlu1 %v921_v30  ;;  %v1572_v30 = vld [vmem:[#allocation11] ss:$0 sm:$0xff] }
 0x44a   : > { %760 = vrot.lane.b32.xlu0 %v664_v9, %s2415_s18  ;;  %s2287_s18 = scalar_lea.vmem %s2950_s1, 128 }
 0x44b   : > { %p2288_p6 = scmp.ne.s32.totalorder %s2950_s1, %s2287_s18 }
 0x44c   : > { %926 = vrot.lane.b32.xlu1 %v664_v9, %s2416_s30  ;;  %v1212_v9 = vld [vmem:[#allocation17 + $0x18] sm:$0xff]  ;;  %s2291_s30 = sshll.u32 %s2418_s0, 4  ;;  %s2292_s30 = int_to_ptr.vmem [resolvable:$false] %s2291_s30 }
 0x44d   : > { %v1733_v10 = vpack.c.bf16 %v1212_v9, %v1211_v7  ;;  %p2289_p10 = pnand %p2288_p6, %p3060_p5  ;;  %p2294_p2 = scmp.lt.s32.totalorder %s2950_s1, %s2292_s30 }
 0x44f   : > { %p2290_p1 = pneg %p2289_p10 }
 0x4c1   : > { %v757_v31 = vpop.xlane.xlu0 %756 }
 0x4c2   : > { %1941 = vrcp.f32 %v757_v31 }
 0x4c5   : > { %v761_v32 = vpop.permute.xlu0 %760 }
 0x4c6   : > { %1640 = vmatpush3.msra.mxu1 %v761_v32  ;;  %v1573_v32 = vld [vmem:[#allocation12] ss:$0 sm:$0xff] }
 0x4c7   : > { %1649 = vmatprep.subr.mxu1 %v2411_v1 }
 0x4c8   : > { %v923_v33 = vpop.xlane.xlu1 %922 }
 0x4c9   : > { %1943 = vrcp.f32 %v923_v33 }
 0x4cc   : > { %v1942_v34 = vpop.eup %1941  ;;  %v927_v36 = vpop.permute.xlu1 %926 }
 0x4cd   : > { %v759_v35 = vmul.f32 %v1942_v34, %v1938_v27 }
 0x4cf   : > { %1642 = vmatmul.mubr.msk.f32.vlgmr.msra.gmra.mrb[4].mxu1 %vm748_vm3, %v759_v35  ;;  %v1223_v35 = vld [vmem:[#allocation17 + $0x70] sm:$0xff] }
 0x4d0   : > { %1650 = vmatpush3.msra.mxu1 %v927_v36  ;;  %1651 = vmatprep.mubr.msk.f32.mxu1 %vm2410_vm0, %v2411_v1  ;;  %v1224_v36 = vld [vmem:[#allocation17 + $0x78] sm:$0xff] }
 0x4d1   : > { %1717 = vmatprep.subr.bf16.mxu1 %v2409_v0 }
 0x4d3   : > { %v1944_v37 = vpop.eup %1943 }
 0x4d4   : > { %v925_v38 = vmul.f32 %v1944_v37, %v1940_v29  ;;  %v1751_v37 = vpack.c.bf16 %v1224_v36, %v1223_v35 }
 0x4d6   : > { %1652 = vmatmul.mubr.msk.f32.vlgmr.msra.gmra.mrb[6].mxu1 %vm748_vm3, %v925_v38  ;;  %v1574_v38 = vld [vmem:[#allocation15] ss:$0 sm:$0xff] }
 0x4d7   : > { %1662 = vmatprep.mubr.msk.f32.mxu1 %vm2410_vm0, %v2411_v1  ;;  %1719 = vmatpush3.bf16.msra.mxu1 %v1718_v41 }
 0x4d8   : > { %1720 = vmatprep.subr.bf16.mxu1 %v2409_v0 }
 0x4db   : > { %1722 = vmatpush3.bf16.msra.mxu1 %v1721_v44 }
 0x4dc   : > { %1723 = vmatprep.subr.bf16.mxu1 %v2409_v0 }
 0x5a2   : > { %v832_v45 = vpop.f32.mrb[4].mxu1 }
 0x5a3   : > { %836 = vst.msk [vmem:[#allocation2] sm:$0xff] %vm672_vm2, %v832_v45  ;;  %v1643_v46 = vpop.f32.mrb[5].mxu1 }
 0x5a9   : > { %v998_v47 = vpop.f32.mrb[6].mxu1 }
 0x5aa   : > { %1003 = vrot.lane.b32.xlu1 %v998_v47, %s2417_s24  ;;  %v1653_v48 = vpop.f32.mrb[7].mxu1  ;;  %s2293_s24 = scalar_lea.vmem %s2292_s30, 256 }
 0x5ab   : > { %p2295_p4 = scmp.lt.s32.totalorder %s2293_s24, %s2287_s18 }
 0x5ad   : > { %p2296_p9 = por %p2295_p4, %p2294_p2 }
 0x5af   : > { %p2297_p8 = pnand %p2296_p9, %p2290_p1 }
 0x61c   : > { %v1004_v49 = vpop.permute.xlu1 %1003 }
 0x61d   : > { %1007 = vst.msk [vmem:[#allocation2] sm:$0xff] %vm1006_vm4, %v1004_v49 }
 0x624   : > { %v1008_v50 = vld [vmem:[#allocation2] sm:$0xff] }
 0x625   : > { %1663 = vmatmul.mubr.msk.f32.vlgmr.msra.gmra.mrb[8].mxu1 %vm594_vm1, %v1008_v50 }
 0x626   : > { %1673 = vmatprep.mubr.msk.f32.mxu1 %vm2410_vm0, %v2411_v1  ;;  %1725 = vmatpush3.bf16.msra.mxu1 %v1724_v2  ;;  %v1126_v1 = vld [vmem:[#allocation14 + $0x10] sm:$0xff] }
 0x627   : > { %1726 = vmatprep.subr.bf16.mxu1 %v2409_v0  ;;  %v1727_v4 = vpack.c.bf16 %v1127_v3, %v1126_v1 }
 0x62a   : > { %1728 = vmatpush3.bf16.msra.mxu1 %v1727_v4 }
 0x6f8   : > { %v1089_v52 = vpop.f32.mrb[8].mxu1 }
 0x6f9   : > { %v1090_v53 = vadd.f32 %v1570_v51, %v1089_v52  ;;  %v1664_v54 = vpop.f32.mrb[9].mxu1 }
 0x6fb   : > { %v1093_v55 = vadd.f32 %v1090_v53, %v2893_v8  ;;  %v1730_v8 = vpack.c.bf16 %v1210_v6, %v1209_v5 }
 0x6fd   : > { %v1094_v56 = vsel %vm594_vm1, %v1093_v55, 0.0  ;;  %1731 = vmatpush3.bf16.msra.mxu0 %v1730_v8 }
 0x6fe   : > { %1095 = vadd.xlane.f32.xlu0 %v1094_v56  ;;  %1732 = vmatprep.subr.bf16.mxu0 %v2409_v0 }
 0x701   : > { %1734 = vmatpush3.bf16.msra.mxu0 %v1733_v10 }
 0x702   : > { %1735 = vmatprep.subr.bf16.mxu0 %v2409_v0 }
 0x705   : > { %1737 = vmatpush3.bf16.msra.mxu0 %v1736_v13 }
 0x706   : > { %1738 = vmatprep.subr.bf16.mxu0 %v2409_v0 }
 0x709   : > { %1740 = vmatpush3.bf16.msra.mxu0 %v1739_v16 }
 0x70a   : > { %1741 = vmatprep.subr.bf16.mxu0 %v2409_v0 }
 0x70d   : > { %1743 = vmatpush3.bf16.msra.mxu0 %v1742_v19 }
 0x70e   : > { %1744 = vmatprep.subr.bf16.mxu0 %v2409_v0 }
 0x711   : > { %1746 = vmatpush3.bf16.msra.mxu0 %v1745_v22 }
 0x712   : > { %1747 = vmatprep.subr.bf16.mxu0 %v2409_v0 }
 0x715   : > { %1749 = vmatpush3.bf16.msra.mxu0 %v1748_v25 }
 0x716   : > { %1750 = vmatprep.subr.bf16.mxu0 %v2409_v0 }
 0x719   : > { %1752 = vmatpush3.bf16.msra.mxu0 %v1751_v37 }
 0x78b   : > { %v1096_v57 = vpop.xlane.xlu0 %1095 }
 0x78c   : > { %v1098_v58 = vmul.f32 0.03125, %v1096_v57  ;;  %v1577_v57 = vld [vmem:[#allocation20] ss:$0 sm:$0xff] }
 0x78e   : > { %v1099_v59 = vsub.f32 %v1093_v55, %v1098_v58 }
 0x790   : > { %v1100_v60 = vmul.f32 %v1099_v59, %v1099_v59 }
 0x792   : > { %v1101_v61 = vsel %vm594_vm1, %v1100_v60, 0.0 }
 0x793   : > { %1102 = vadd.xlane.f32.xlu1 %v1101_v61 }
 0x820   : > { %v1103_v26 = vpop.xlane.xlu1 %1102 }
 0x821   : > { %v1104_v27 = vmul.f32 0.03125, %v1103_v26 }
 0x823   : > { %v1105_v28 = vadd.f32 1e-05, %v1104_v27 }
 0x825   : > { %1945 = vrsqrt.f32 %v1105_v28 }
 0x82f   : > { %v1946_v29 = vpop.eup %1945 }
 0x830   : > { %v1107_v31 = vmul.f32 %v1946_v29, %v1099_v59  ;;  %v1578_v59 = vld [vmem:[#allocation21] ss:$0 sm:$0xff] }
 0x832   : > { %v1115_v33 = vmul.f32 %v1572_v30, %v1107_v31 }
 0x834   : > { %v1123_v34 = vadd.f32 %v1573_v32, %v1115_v33 }
 0x836   : > { %1674 = vmatmul.mubr.msk.f32.vlgmr.msra.gmra.mrb[10].mxu1 %vm594_vm1, %v1123_v34 }
 0x909   : > { %v1204_v39 = vpop.f32.mrb[10].mxu1 }
 0x90a   : > { %v1205_v40 = vadd.f32 %v1574_v38, %v1204_v39  ;;  %v1675_v0 = vpop.f32.mrb[11].mxu1 }
 0x90c   : > { %v1208_v41 = vmax.f32 %v1205_v40, 0.0 }
 0x90e   : > { %1709 = vmatmul.mubr.f32.vlgmr.msra.gmra.mrb[2].mxu0 %v1208_v41 }
 0x9e1   : > { %v1298_v43 = vpop.f32.mrb[2].mxu0 }
 0x9e2   : > { %v1299_v44 = vadd.f32 %v1576_v42, %v1298_v43  ;;  %v1710_v45 = vpop.f32.mrb[3].mxu0 }
 0x9e4   : > { %v1302_v46 = vadd.f32 %v1299_v44, %v1123_v34 }
 0x9e6   : > { %v1303_v47 = vsel %vm594_vm1, %v1302_v46, 0.0 }
 0x9e7   : > { %1304 = vadd.xlane.f32.xlu0 %v1303_v47 }
 0xa74   : > { %v1305_v48 = vpop.xlane.xlu0 %1304 }
 0xa75   : > { %v1306_v49 = vmul.f32 0.03125, %v1305_v48 }
 0xa77   : > { %v1307_v50 = vsub.f32 %v1302_v46, %v1306_v49 }
 0xa79   : > { %v1308_v51 = vmul.f32 %v1307_v50, %v1307_v50 }
 0xa7b   : > { %v1309_v52 = vsel %vm594_vm1, %v1308_v51, 0.0 }
 0xa7c   : > { %1310 = vadd.xlane.f32.xlu0 %v1309_v52 }
 0xb09   : > { %v1311_v53 = vpop.xlane.xlu0 %1310 }
 0xb0a   : > { %v1312_v54 = vmul.f32 0.03125, %v1311_v53 }
 0xb0c   : > { %v1313_v55 = vadd.f32 1e-05, %v1312_v54 }
 0xb0e   : > { %1947 = vrsqrt.f32 %v1313_v55 }
 0xb18   : > { %v1948_v56 = vpop.eup %1947 }
 0xb19   : > { %v1315_v58 = vmul.f32 %v1948_v56, %v1307_v50 }
 0xb1b   : > { %v1323_v60 = vmul.f32 %v1577_v57, %v1315_v58 }
 0xb1d   : > { %v1331_v61 = vadd.f32 %v1578_v59, %v1323_v60 }
 0xb1f   : > { %1332 = vst.msk [vmem:[%s588_s3] sm:$0xff] %vm594_vm1, %v1331_v61 }
 0xb20   : > { %2300 = shalt.err (!%p2297_p8)
}
 0xb21   : > { %s2301_s16 = scalar_lea.hbm %s2948_s13, 128  ;;  %s2305_s3 = scalar_lea.hbm %s3059_s20, 256 }
 0xb22   : > { %p2302_p3 = scmp.ne.s32.totalorder %s2948_s13, %s2301_s16  ;;  %p2306_p0 = scmp.lt.u32.totalorder %s2948_s13, %s3059_s20 }
 0xb23   : > { %p2307_p11 = scmp.lt.u32.totalorder %s2305_s3, %s2301_s16  ;;  %p2309_p6 = scmp.lt.u32.totalorder %s2301_s16, %s2948_s13 }
 0xb24   : > { %p2303_p12 = pnand %p2302_p3, %p3060_p5 }
 0xb25   : > { %p2308_p7 = por %p2307_p11, %p2306_p0 }
 0xb26   : > { %p2304_p13 = pneg %p2303_p12 }
 0xb27   : > { %p2310_p10 = por %p2309_p6, %p2308_p7 }
 0xb29   : > { %p2311_p1 = pnand %p2310_p10, %p2304_p13 }
 0xb2b   : > { %2314 = shalt.err (!%p2311_p1)
}
 0xb2c   : > { %1799 = dma.vmem_to_hbm [thread:$0]  (%p3060_p5), %s2950_s1, 128, %s2948_s13, %s1334_s14  }
 0xb2d PF: > { %s3061_s18 = sld [smem:[#allocation32_spill]]  ;;  %p3062_p2 = scmp.ne.s32.totalorder %s3050_s27, 0 }
 0xb2e   : > { %p3063_p4 = scmp.ge.s32.totalorder %s2393_s26, 2 }
 0xb30   : > { %p1840_p9 = pnand %p3063_p4, %p3062_p2 }
 0xb33   : > { %s1360_s0 = sand.u32 1, %s3061_s18  }
 0xb34   : > { %s1361_s30 = scalar_lea.sflag [#allocation5], %s1360_s0 }
 0xb35   : > { %2368 = dma.done.wait (!%p1840_p9), %s1361_s30, 128  }
 0xb36   : > { %2370 = vsyncadd (!%p1840_p9), %s1361_s30, 4294967168  ;;  %s34_s26 = sadd.s32 1, %s2393_s26   ;;  %s3064_s21 = smov %s2377_s22 }
 0xb37   : > { %p31_p8 = scmp.ge.s32.totalorder %s34_s26, 4   ;;  %s3065_s22 = smov %s2381_s23 }
 0xb38   : > { %s3066_s23 = smov %s2800_s15  ;;  %s3067_s24 = smov %s2389_s25 }
 0xb39   : > { %s3068_s25 = smov %s3070_s19  ;;  %33 = sbr.rel (!%p31_p8) target bundleno = 18 (0x12), region = 157 }
 0xb40   :  { %1366 = vsyncpa [#allocation4], 1 }
 0xb41   :  { %1368 = vsyncpa [#allocation4 + $0x1], 1 }
 0xb42   :  { %1369 = vsyncpa [#allocation7], 1 }
 0xb43   :  { %1370 = vsyncpa [#allocation10], 1 }
 0xb44   :  { %1371 = vsyncpa [#allocation13], 1 }
 0xb45   :  { %1372 = vsyncpa [#allocation16], 1 }
 0xb46   :  { %1373 = vsyncpa [#allocation19], 1 }
 0xb47   :  { %1374 = vsyncpa [#allocation22], 1 }
 0xb48   :  { %1375 = vsyncpa [#allocation5], 1 }
 0xb49   :  { %1377 = vsyncpa [#allocation5 + $0x1], 1 }

</bundles_post_ra>
